<compile_context>
chip_gen: v6e
topology: v6e:2x2x1
jax: 0.10.0
libtpu: 0.0.40
codegen_flags: <defaults>
</compile_context>

<pallas_src>
import jax
import jax.numpy as jnp
from jax.experimental import pallas as pl
from jax.experimental.pallas import tpu as pltpu


def _round_up(x, m):
    return (x + m - 1) // m * m


def _cdiv(a, b):
    return (a + b - 1) // b


def _head_kernel(h_ref, w1_ref, b1_ref, w2_ref, b2_ref, o_ref, z_acc):
    """Fused Linear -> tanh -> (eval dropout) -> Linear, K-split over d_model."""
    k = pl.program_id(1)

    @pl.when(k == 0)
    def _():
        z_acc[...] = jnp.zeros_like(z_acc)

    # linear_hidden partial product: [TB, TK] @ [TK, Dp] -> f32 accumulator
    # (native-dtype, typically bf16, operands on the MXU).
    z_acc[...] += jnp.dot(h_ref[...], w1_ref[...],
                          preferred_element_type=jnp.float32)

    @pl.when(k == pl.num_programs(1) - 1)
    def _():
        z = z_acc[...] + b1_ref[...].astype(jnp.float32)
        t = jnp.tanh(z)  # f32 tanh on the EUP (exact on v5e as well).
        # Dropout: inference-mode identity.
        # TODO(synk): training-mode dropout would need pltpu.prng_seed +
        # pltpu.stateful_bernoulli(config.hidden_dropout).
        # TODO(synk): optional micro-opt — split TB into row sub-blocks
        # (lax.fori_loop unroll=True) so matmul2 (MXU) overlaps tanh (EUP).
        out = jnp.dot(t.astype(w2_ref.dtype), w2_ref[...],
                      preferred_element_type=jnp.float32)
        out = out + b2_ref[...].astype(jnp.float32)
        o_ref[...] = out.astype(o_ref.dtype)


def prepare_funnel_head_params(w1, b1, w2, b2, *, compute_dtype=jnp.bfloat16):
    """Pad/cast parameters ONCE at model-load time (out of the per-call path).

    Weights are stored [in_features, out_features] (x @ W + b), i.e. the
    transpose of PyTorch's [out, in]. Feature dims are zero-padded to
    multiples of 128 so every matmul/store is lane-dense; padded rows/cols
    contribute exactly 0 to real outputs.
    """
    D = w1.shape[0]
    L = w2.shape[1]
    Dp = _round_up(D, 128)
    Lp = _round_up(L, 128)
    w1_p = jnp.pad(w1, ((0, Dp - D), (0, Dp - D))).astype(compute_dtype)
    w2_p = jnp.pad(w2, ((0, Dp - D), (0, Lp - L))).astype(compute_dtype)
    b1_p = jnp.pad(jnp.asarray(b1).reshape(1, -1).astype(jnp.float32),
                   ((0, 0), (0, Dp - D)))
    b2_p = jnp.pad(jnp.asarray(b2).reshape(1, -1).astype(jnp.float32),
                   ((0, 0), (0, Lp - L)))
    return {"w1": w1_p, "b1": b1_p, "w2": w2_p, "b2": b2_p,
            "d_model": D, "n_labels": L, "compute_dtype": compute_dtype}


def _vmem_limit_bytes():
    # ~48 MiB on v7x (64 MiB physical), capped at ~100 MiB on v5e/v6e (128 MiB).
    try:
        cap = int(pltpu.get_tpu_info().vmem_capacity_bytes)
    except Exception:
        cap = 64 * 1024 * 1024
    return int(min(max(cap - 16 * 1024 * 1024, 32 * 1024 * 1024),
                   100 * 1024 * 1024))


def funnel_classification_head(hidden, params, *, block_b=512, out_dtype=None):
    """hidden: [B, D] (any float dtype); params: from prepare_funnel_head_params."""
    B, D = hidden.shape
    assert D == params["d_model"], (D, params["d_model"])
    L = params["n_labels"]
    cd = params["compute_dtype"]
    w1_p, b1_p, w2_p, b2_p = params["w1"], params["b1"], params["w2"], params["b2"]
    Dp = w1_p.shape[0]
    Lp = w2_p.shape[1]
    out_dtype = out_dtype or hidden.dtype

    # --- adaptive batch tile (amortize ~0.35us/step, minimize batch padding) --
    n_b = max(1, _cdiv(B, block_b))
    TB = _round_up(_cdiv(B, n_b), 8)
    Bp = _round_up(B, TB)
    # v7x has 2 TensorCores: give the "parallel" batch axis >=2 steps when the
    # batch is big enough so both cores get work (harmless on v5e/v6e).
    if Bp // TB < 2 and B > 8:
        TB = _round_up(_cdiv(B, 2), 8)
        Bp = _round_up(B, TB)

    vmem_limit = _vmem_limit_bytes()
    itemsize = jnp.dtype(cd).itemsize
    out_itemsize = jnp.dtype(out_dtype).itemsize

    # --- K-split so W1 need not be fully VMEM-resident for large d_model -----
    def vmem_need(tk, nk):
        w1_bufs = 1 if nk == 1 else 2
        return (2 * TB * tk * itemsize          # hidden blocks (double-buffered)
                + w1_bufs * tk * Dp * itemsize  # W1 blocks
                + Dp * Lp * itemsize            # W2 (resident)
                + (Dp + Lp) * 4                 # biases (f32)
                + 2 * TB * Lp * out_itemsize    # output blocks
                + TB * Dp * 4)                  # f32 z accumulator

    TK, n_k = 128, Dp // 128                     # worst-case fallback
    for cand_nk in range(1, Dp // 128 + 1):
        if Dp % (cand_nk * 128) != 0:
            continue
        cand_tk = Dp // cand_nk
        if vmem_need(cand_tk, cand_nk) <= int(vmem_limit * 0.8):
            TK, n_k = cand_tk, cand_nk
            break

    # --- pad activations only when needed (no-op for aligned shapes) ---------
    hidden_c = hidden.astype(cd)
    if (Bp, Dp) != (B, D):
        hidden_c = jnp.pad(hidden_c, ((0, Bp - B), (0, Dp - D)))

    cost = pl.CostEstimate(
        flops=2 * Bp * Dp * Dp + 2 * Bp * Dp * Lp,
        transcendentals=Bp * Dp,
        bytes_accessed=(hidden_c.size * itemsize
                        + w1_p.size * itemsize + w2_p.size * itemsize
                        + b1_p.size * 4 + b2_p.size * 4
                        + Bp * Lp * out_itemsize),
    )

    grid = (Bp // TB, n_k)

    def run(single_buffer_weights):
        def const2d(shape):
            if single_buffer_weights:
                return pl.BlockSpec(shape, lambda i, k: (0, 0),
                                    pipeline_mode=pl.Buffered(1))
            return pl.BlockSpec(shape, lambda i, k: (0, 0))

        if n_k == 1:
            w1_spec = const2d((TK, Dp))                       # invariant block
        else:
            w1_spec = pl.BlockSpec((TK, Dp), lambda i, k: (k, 0))  # K-streamed

        return pl.pallas_call(
            _head_kernel,
            out_shape=jax.ShapeDtypeStruct((Bp, Lp), out_dtype),
            grid=grid,
            in_specs=[
                pl.BlockSpec((TB, TK), lambda i, k: (i, k)),  # hidden streamed
                w1_spec,                                      # W1
                const2d((1, Dp)),                             # b1 resident
                const2d((Dp, Lp)),                            # W2 resident
                const2d((1, Lp)),                             # b2 resident
            ],
            out_specs=pl.BlockSpec((TB, Lp), lambda i, k: (i, 0)),
            scratch_shapes=[pltpu.VMEM((TB, Dp), jnp.float32)],
            compiler_params=pltpu.CompilerParams(
                dimension_semantics=("parallel", "arbitrary"),
                vmem_limit_bytes=vmem_limit,
            ),
            cost_estimate=cost,
        )(hidden_c, w1_p, b1_p, w2_p, b2_p)

    try:
        out_p = run(True)
    except Exception:
        # Fallback if this jax version rejects pipeline_mode=pl.Buffered(1);
        # identical math, just default double-buffered weight blocks.
        out_p = run(False)

    if (Bp, Lp) != (B, L):
        out_p = out_p[:B, :L]
    return out_p


if __name__ == "__main__":
    # Small synthetic config: batch=8, d_model=32, n_labels=4.
    B, D, L = 8, 32, 4

    key = jax.random.PRNGKey(0)
    k_h, k_w1, k_b1, k_w2, k_b2 = jax.random.split(key, 5)

    hidden = jax.random.normal(k_h, (B, D), dtype=jnp.float32)
    # Deterministic parameter init (synthetic, no checkpoint load).
    w1 = jax.random.normal(k_w1, (D, D), dtype=jnp.float32) * 0.05
    b1 = jax.random.normal(k_b1, (D,), dtype=jnp.float32) * 0.05
    w2 = jax.random.normal(k_w2, (D, L), dtype=jnp.float32) * 0.05
    b2 = jax.random.normal(k_b2, (L,), dtype=jnp.float32) * 0.05

    params = prepare_funnel_head_params(w1, b1, w2, b2)   # bf16 MXU path
    out = funnel_classification_head(hidden, params)
    out = jax.block_until_ready(out)

    # Pure-JAX reference with matching bf16-input / f32-accumulate semantics
    # (eval-mode dropout = identity).
    f32 = jnp.float32
    hb = hidden.astype(jnp.bfloat16).astype(f32)
    w1b = w1.astype(jnp.bfloat16).astype(f32)
    w2b = w2.astype(jnp.bfloat16).astype(f32)
    t = jnp.tanh(hb @ w1b + b1[None, :])
    ref = t.astype(jnp.bfloat16).astype(f32) @ w2b + b2[None, :]

    assert out.shape == (B, L), out.shape
    assert out.dtype == hidden.dtype, out.dtype
    assert jnp.allclose(out.astype(f32), ref, atol=5e-3, rtol=5e-3), \
        float(jnp.max(jnp.abs(out.astype(f32) - ref)))

    print("KERNEL_OK")
</pallas_src>

<mosaic_0001>
module attributes {stable_mosaic.version = 11 : i64} {
  func.func @_head_kernel(%arg0: i32, %arg1: i32, %arg2: memref<8x128xbf16, #tpu.memory_space<vmem>>, %arg3: memref<128x128xbf16, #tpu.memory_space<vmem>>, %arg4: memref<1x128xf32, #tpu.memory_space<vmem>>, %arg5: memref<128x128xbf16, #tpu.memory_space<vmem>>, %arg6: memref<1x128xf32, #tpu.memory_space<vmem>>, %arg7: memref<8x128xf32, #tpu.memory_space<vmem>>, %arg8: memref<8x128xf32, #tpu.memory_space<vmem>>) attributes {dimension_semantics = [#tpu.dimension_semantics<parallel>, #tpu.dimension_semantics<arbitrary>], iteration_bounds = array<i64: 1, 1>, scalar_prefetch = 0 : i64, scratch_operands = 1 : i64, tpu.core_type = #tpu.core_type<tc>, window_params = [{transform_indices = @transform_0, window_bounds = array<i64: 8, 128>}, {pipeline_mode = #tpu.pipeline_mode<synchronous>, transform_indices = @transform_1, window_bounds = array<i64: 128, 128>}, {pipeline_mode = #tpu.pipeline_mode<synchronous>, transform_indices = @transform_2, window_bounds = array<i64: 1, 128>}, {pipeline_mode = #tpu.pipeline_mode<synchronous>, transform_indices = @transform_3, window_bounds = array<i64: 128, 128>}, {pipeline_mode = #tpu.pipeline_mode<synchronous>, transform_indices = @transform_4, window_bounds = array<i64: 1, 128>}, {transform_indices = @transform_5, window_bounds = array<i64: 8, 128>}]} {
    %c0_i32 = arith.constant 0 : i32
    %0 = arith.cmpi eq, %arg1, %c0_i32 : i32
    %1 = arith.extui %0 : i1 to i32
    %c0_i32_0 = arith.constant 0 : i32
    %2 = arith.cmpi ne, %1, %c0_i32_0 : i32
    scf.if %2 {
      %cst_10 = arith.constant 0.000000e+00 : f32
      %12 = vector.broadcast %cst_10 : f32 to vector<8x128xf32>
      %c0_11 = arith.constant 0 : index
      %c0_12 = arith.constant 0 : index
      %13 = vector.load %arg8[%c0_11, %c0_12] : memref<8x128xf32, #tpu.memory_space<vmem>>, vector<8x128xf32>
      tpu.vector_store %arg8[%c0_11, %c0_12], %12 {strides = array<i32>} : memref<8x128xf32, #tpu.memory_space<vmem>>, vector<8x128xf32>,
    } else {
    }
    %c0 = arith.constant 0 : index
    %c0_1 = arith.constant 0 : index
    %3 = vector.load %arg8[%c0, %c0_1] : memref<8x128xf32, #tpu.memory_space<vmem>>, vector<8x128xf32>
    %c0_2 = arith.constant 0 : index
    %c0_3 = arith.constant 0 : index
    %4 = vector.load %arg2[%c0_2, %c0_3] : memref<8x128xbf16, #tpu.memory_space<vmem>>, vector<8x128xbf16>
    %c0_4 = arith.constant 0 : index
    %c0_5 = arith.constant 0 : index
    %5 = vector.load %arg3[%c0_4, %c0_5] : memref<128x128xbf16, #tpu.memory_space<vmem>>, vector<128x128xbf16>
    %cst = arith.constant dense<0.000000e+00> : vector<8x128xf32>
    %6 = tpu.matmul %4, %5, %cst {dimension_numbers = #tpu.dot_dimension_numbers<[1], [0], [0], [1], [0, 0, 1, 1], [], []>} : vector<8x128xbf16>, vector<128x128xbf16>, vector<8x128xf32> -> vector<8x128xf32>
    %7 = arith.addf %3, %6 : vector<8x128xf32>
    %c0_6 = arith.constant 0 : index
    %c0_7 = arith.constant 0 : index
    %8 = vector.load %arg8[%c0_6, %c0_7] : memref<8x128xf32, #tpu.memory_space<vmem>>, vector<8x128xf32>
    tpu.vector_store %arg8[%c0_6, %c0_7], %7 {strides = array<i32>} : memref<8x128xf32, #tpu.memory_space<vmem>>, vector<8x128xf32>,
    %c0_i32_8 = arith.constant 0 : i32
    %9 = arith.cmpi eq, %arg1, %c0_i32_8 : i32
    %10 = arith.extui %9 : i1 to i32
    %c0_i32_9 = arith.constant 0 : i32
    %11 = arith.cmpi ne, %10, %c0_i32_9 : i32
    scf.if %11 {
      %c0_10 = arith.constant 0 : index
      %c0_11 = arith.constant 0 : index
      %12 = vector.load %arg8[%c0_10, %c0_11] : memref<8x128xf32, #tpu.memory_space<vmem>>, vector<8x128xf32>
      %c0_12 = arith.constant 0 : index
      %c0_13 = arith.constant 0 : index
      %13 = vector.load %arg4[%c0_12, %c0_13] : memref<1x128xf32, #tpu.memory_space<vmem>>, vector<1x128xf32>
      %14 = vector.broadcast %13 : vector<1x128xf32> to vector<8x128xf32>
      %15 = arith.addf %12, %14 : vector<8x128xf32>
      %16 = math.tanh %15 : vector<8x128xf32>
      %17 = arith.truncf %16 : vector<8x128xf32> to vector<8x128xbf16>
      %c0_14 = arith.constant 0 : index
      %c0_15 = arith.constant 0 : index
      %18 = vector.load %arg5[%c0_14, %c0_15] : memref<128x128xbf16, #tpu.memory_space<vmem>>, vector<128x128xbf16>
      %cst_16 = arith.constant dense<0.000000e+00> : vector<8x128xf32>
      %19 = tpu.matmul %17, %18, %cst_16 {dimension_numbers = #tpu.dot_dimension_numbers<[1], [0], [0], [1], [0, 0, 1, 1], [], []>} : vector<8x128xbf16>, vector<128x128xbf16>, vector<8x128xf32> -> vector<8x128xf32>
      %c0_17 = arith.constant 0 : index
      %c0_18 = arith.constant 0 : index
      %20 = vector.load %arg6[%c0_17, %c0_18] : memref<1x128xf32, #tpu.memory_space<vmem>>, vector<1x128xf32>
      %21 = vector.broadcast %20 : vector<1x128xf32> to vector<8x128xf32>
      %22 = arith.addf %19, %21 : vector<8x128xf32>
      %c0_19 = arith.constant 0 : index
      %c0_20 = arith.constant 0 : index
      %23 = vector.load %arg7[%c0_19, %c0_20] : memref<8x128xf32, #tpu.memory_space<vmem>>, vector<8x128xf32>
      tpu.vector_store %arg7[%c0_19, %c0_20], %22 {strides = array<i32>} : memref<8x128xf32, #tpu.memory_space<vmem>>, vector<8x128xf32>,
    } else {
    }
    return
  }
  func.func @transform_0(%arg0: i32, %arg1: i32) -> (i32, i32) {
    %c0_i32 = arith.constant 0 : i32
    return %arg0, %arg1 : i32, i32
  }
  func.func @transform_1(%arg0: i32, %arg1: i32) -> (i32, i32) {
    %c0_i32 = arith.constant 0 : i32
    %c0_i32_0 = arith.constant 0 : i32
    %c0_i32_1 = arith.constant 0 : i32
    return %c0_i32, %c0_i32_0 : i32, i32
  }
  func.func @transform_2(%arg0: i32, %arg1: i32) -> (i32, i32) {
    %c0_i32 = arith.constant 0 : i32
    %c0_i32_0 = arith.constant 0 : i32
    %c0_i32_1 = arith.constant 0 : i32
    return %c0_i32, %c0_i32_0 : i32, i32
  }
  func.func @transform_3(%arg0: i32, %arg1: i32) -> (i32, i32) {
    %c0_i32 = arith.constant 0 : i32
    %c0_i32_0 = arith.constant 0 : i32
    %c0_i32_1 = arith.constant 0 : i32
    return %c0_i32, %c0_i32_0 : i32, i32
  }
  func.func @transform_4(%arg0: i32, %arg1: i32) -> (i32, i32) {
    %c0_i32 = arith.constant 0 : i32
    %c0_i32_0 = arith.constant 0 : i32
    %c0_i32_1 = arith.constant 0 : i32
    return %c0_i32, %c0_i32_0 : i32, i32
  }
  func.func @transform_5(%arg0: i32, %arg1: i32) -> (i32, i32) {
    %c0_i32 = arith.constant 0 : i32
    %c0_i32_0 = arith.constant 0 : i32
    return %arg0, %c0_i32 : i32, i32
  }
}

module attributes {stable_mosaic.version = 11 : i64} {
  func.func @_head_kernel(%arg0: i32, %arg1: i32, %arg2: memref<8x128xbf16, #tpu.memory_space<vmem>>, %arg3: memref<128x128xbf16, #tpu.memory_space<vmem>>, %arg4: memref<1x128xf32, #tpu.memory_space<vmem>>, %arg5: memref<128x128xbf16, #tpu.memory_space<vmem>>, %arg6: memref<1x128xf32, #tpu.memory_space<vmem>>, %arg7: memref<8x128xf32, #tpu.memory_space<vmem>>, %arg8: memref<8x128xf32, #tpu.memory_space<vmem>>) attributes {dimension_semantics = [#tpu.dimension_semantics<parallel>, #tpu.dimension_semantics<arbitrary>], iteration_bounds = array<i64: 1, 1>, scalar_prefetch = 0 : i64, scratch_operands = 1 : i64, tpu.core_type = #tpu.core_type<tc>, window_params = [{transform_indices = @transform_0, window_bounds = array<i64: 8, 128>}, {pipeline_mode = #tpu.pipeline_mode<synchronous>, transform_indices = @transform_1, window_bounds = array<i64: 128, 128>}, {pipeline_mode = #tpu.pipeline_mode<synchronous>, transform_indices = @transform_2, window_bounds = array<i64: 1, 128>}, {pipeline_mode = #tpu.pipeline_mode<synchronous>, transform_indices = @transform_3, window_bounds = array<i64: 128, 128>}, {pipeline_mode = #tpu.pipeline_mode<synchronous>, transform_indices = @transform_4, window_bounds = array<i64: 1, 128>}, {transform_indices = @transform_5, window_bounds = array<i64: 8, 128>}]} {
    %c0_i32 = arith.constant 0 : i32
    %0 = arith.cmpi eq, %arg1, %c0_i32 : i32
    %1 = arith.extui %0 : i1 to i32
    %c0_i32_0 = arith.constant 0 : i32
    %2 = arith.cmpi ne, %1, %c0_i32_0 : i32
    scf.if %2 {
      %cst_10 = arith.constant 0.000000e+00 : f32
      %12 = vector.broadcast %cst_10 : f32 to vector<8x128xf32>
      %c0_11 = arith.constant 0 : index
      %c0_12 = arith.constant 0 : index
      %13 = vector.load %arg8[%c0_11, %c0_12] : memref<8x128xf32, #tpu.memory_space<vmem>>, vector<8x128xf32>
      tpu.vector_store %arg8[%c0_11, %c0_12], %12 {strides = array<i32>} : memref<8x128xf32, #tpu.memory_space<vmem>>, vector<8x128xf32>,
    } else {
    }
    %c0 = arith.constant 0 : index
    %c0_1 = arith.constant 0 : index
    %3 = vector.load %arg8[%c0, %c0_1] : memref<8x128xf32, #tpu.memory_space<vmem>>, vector<8x128xf32>
    %c0_2 = arith.constant 0 : index
    %c0_3 = arith.constant 0 : index
    %4 = vector.load %arg2[%c0_2, %c0_3] : memref<8x128xbf16, #tpu.memory_space<vmem>>, vector<8x128xbf16>
    %c0_4 = arith.constant 0 : index
    %c0_5 = arith.constant 0 : index
    %5 = vector.load %arg3[%c0_4, %c0_5] : memref<128x128xbf16, #tpu.memory_space<vmem>>, vector<128x128xbf16>
    %cst = arith.constant dense<0.000000e+00> : vector<8x128xf32>
    %6 = tpu.matmul %4, %5, %cst {dimension_numbers = #tpu.dot_dimension_numbers<[1], [0], [0], [1], [0, 0, 1, 1], [], []>} : vector<8x128xbf16>, vector<128x128xbf16>, vector<8x128xf32> -> vector<8x128xf32>
    %7 = arith.addf %3, %6 : vector<8x128xf32>
    %c0_6 = arith.constant 0 : index
    %c0_7 = arith.constant 0 : index
    %8 = vector.load %arg8[%c0_6, %c0_7] : memref<8x128xf32, #tpu.memory_space<vmem>>, vector<8x128xf32>
    tpu.vector_store %arg8[%c0_6, %c0_7], %7 {strides = array<i32>} : memref<8x128xf32, #tpu.memory_space<vmem>>, vector<8x128xf32>,
    %c0_i32_8 = arith.constant 0 : i32
    %9 = arith.cmpi eq, %arg1, %c0_i32_8 : i32
    %10 = arith.extui %9 : i1 to i32
    %c0_i32_9 = arith.constant 0 : i32
    %11 = arith.cmpi ne, %10, %c0_i32_9 : i32
    scf.if %11 {
      %c0_10 = arith.constant 0 : index
      %c0_11 = arith.constant 0 : index
      %12 = vector.load %arg8[%c0_10, %c0_11] : memref<8x128xf32, #tpu.memory_space<vmem>>, vector<8x128xf32>
      %c0_12 = arith.constant 0 : index
      %c0_13 = arith.constant 0 : index
      %13 = vector.load %arg4[%c0_12, %c0_13] : memref<1x128xf32, #tpu.memory_space<vmem>>, vector<1x128xf32>
      %14 = vector.broadcast %13 : vector<1x128xf32> to vector<8x128xf32>
      %15 = arith.addf %12, %14 : vector<8x128xf32>
      %16 = math.tanh %15 : vector<8x128xf32>
      %17 = arith.truncf %16 : vector<8x128xf32> to vector<8x128xbf16>
      %c0_14 = arith.constant 0 : index
      %c0_15 = arith.constant 0 : index
      %18 = vector.load %arg5[%c0_14, %c0_15] : memref<128x128xbf16, #tpu.memory_space<vmem>>, vector<128x128xbf16>
      %cst_16 = arith.constant dense<0.000000e+00> : vector<8x128xf32>
      %19 = tpu.matmul %17, %18, %cst_16 {dimension_numbers = #tpu.dot_dimension_numbers<[1], [0], [0], [1], [0, 0, 1, 1], [], []>} : vector<8x128xbf16>, vector<128x128xbf16>, vector<8x128xf32> -> vector<8x128xf32>
      %c0_17 = arith.constant 0 : index
      %c0_18 = arith.constant 0 : index
      %20 = vector.load %arg6[%c0_17, %c0_18] : memref<1x128xf32, #tpu.memory_space<vmem>>, vector<1x128xf32>
      %21 = vector.broadcast %20 : vector<1x128xf32> to vector<8x128xf32>
      %22 = arith.addf %19, %21 : vector<8x128xf32>
      %c0_19 = arith.constant 0 : index
      %c0_20 = arith.constant 0 : index
      %23 = vector.load %arg7[%c0_19, %c0_20] : memref<8x128xf32, #tpu.memory_space<vmem>>, vector<8x128xf32>
      tpu.vector_store %arg7[%c0_19, %c0_20], %22 {strides = array<i32>} : memref<8x128xf32, #tpu.memory_space<vmem>>, vector<8x128xf32>,
    } else {
    }
    return
  }
  func.func @transform_0(%arg0: i32, %arg1: i32) -> (i32, i32) {
    %c0_i32 = arith.constant 0 : i32
    return %arg0, %arg1 : i32, i32
  }
  func.func @transform_1(%arg0: i32, %arg1: i32) -> (i32, i32) {
    %c0_i32 = arith.constant 0 : i32
    %c0_i32_0 = arith.constant 0 : i32
    %c0_i32_1 = arith.constant 0 : i32
    return %c0_i32, %c0_i32_0 : i32, i32
  }
  func.func @transform_2(%arg0: i32, %arg1: i32) -> (i32, i32) {
    %c0_i32 = arith.constant 0 : i32
    %c0_i32_0 = arith.constant 0 : i32
    %c0_i32_1 = arith.constant 0 : i32
    return %c0_i32, %c0_i32_0 : i32, i32
  }
  func.func @transform_3(%arg0: i32, %arg1: i32) -> (i32, i32) {
    %c0_i32 = arith.constant 0 : i32
    %c0_i32_0 = arith.constant 0 : i32
    %c0_i32_1 = arith.constant 0 : i32
    return %c0_i32, %c0_i32_0 : i32, i32
  }
  func.func @transform_4(%arg0: i32, %arg1: i32) -> (i32, i32) {
    %c0_i32 = arith.constant 0 : i32
    %c0_i32_0 = arith.constant 0 : i32
    %c0_i32_1 = arith.constant 0 : i32
    return %c0_i32, %c0_i32_0 : i32, i32
  }
  func.func @transform_5(%arg0: i32, %arg1: i32) -> (i32, i32) {
    %c0_i32 = arith.constant 0 : i32
    %c0_i32_0 = arith.constant 0 : i32
    return %arg0, %c0_i32 : i32, i32
  }
}

</mosaic_0001>

<bundles_post_ra>
// kernel: tpu_custom_call.1
= control target key start
LH: loop header
LB: loop body
LE: loop exit
PB: predicated region body
PF: predicated region fallthrough
CT: control target
= control target key end

     0   :  { %10 = vsyncpa [#allocation4], 0  ;;  %s560_s0 = inlined_call_operand.hbm [shape: bf16[8,128], index: 0, kind: input, shape index: {}]   ;;  %s561_s1 = inlined_call_operand.hbm [shape: bf16[128,128], index: 1, kind: input, shape index: {}]   ;;  %s562_s2 = inlined_call_operand.vmem [shape: f32[1,128], index: 2, kind: input, shape index: {}]   ;;  %s563_s3 = inlined_call_operand.hbm [shape: bf16[128,128], index: 3, kind: input, shape index: {}]   ;;  %s564_s4 = inlined_call_operand.vmem [shape: f32[1,128], index: 4, kind: input, shape index: {}]   ;;  %s565_s5 = inlined_call_operand.hbm [shape: f32[8,128], index: 5, kind: output, shape index: {}]  }
   0x1   :  { %11 = vsyncpa [#allocation7], 0 }
   0x2   :  { %12 = vsyncpa [#allocation5], 0  ;;  %s504_s18 = smov [#allocation6]  }
   0x3   :  { %s28_s19 = sshll.u32 %s504_s18, 4  ;;  %s29_s19 = int_to_ptr.vmem [resolvable:$true] %s28_s19 }
   0x4   :  { %s426_s20 = scalar_lea.vmem %s29_s19, 1024  ;;  %p431_p1 = scmp.lt.s32.totalorder %s29_s19, %s29_s19 }
   0x5   :  { %p427_p0 = scmp.ne.s32.totalorder %s29_s19, %s426_s20  ;;  %p432_p2 = scmp.lt.s32.totalorder %s426_s20, %s426_s20 }
   0x7   :  { %p433_p3 = por %p432_p2, %p431_p1 }
   0x9   :  { %p434_p4 = pnand %p433_p3, %p427_p0 }
   0xb   :  { %437 = shalt.err (!%p434_p4)
}
   0xc   :  { %s505_s21 = smov 64   ;;  %s506_s22 = smov 4  }
   0xd   :  { %34 = dma.hbm_to_vmem [thread:$0]  %s561_s1, 1024, %s29_s19, [#allocation7], %s505_s21, %s505_s21, %s506_s22  }
   0xe   :  { %s507_s25 = smov [#allocation3]   ;;  %s508_s27 = smov [#allocation8]  }
   0xf   :  { %s19_s26 = sshll.u32 %s507_s25, 4  ;;  %s42_s28 = sshll.u32 %s508_s27, 4  ;;  %s20_s26 = int_to_ptr.vmem [resolvable:$true] %s19_s26  ;;  %s43_s28 = int_to_ptr.vmem [resolvable:$true] %s42_s28 }
  0x10   :  { %s446_s29 = scalar_lea.vmem %s20_s26, 64  ;;  %p451_p6 = scmp.lt.s32.totalorder %s20_s26, %s20_s26 }
  0x11   :  { %p447_p5 = scmp.ne.s32.totalorder %s20_s26, %s446_s29  ;;  %p452_p7 = scmp.lt.s32.totalorder %s446_s29, %s446_s29 }
  0x13   :  { %p453_p8 = por %p452_p7, %p451_p6 }
  0x15   :  { %p454_p9 = pnand %p453_p8, %p447_p5 }
  0x17   :  { %457 = shalt.err (!%p454_p9)
}
  0x18   :  { %22 = dma.hbm_to_vmem [thread:$0]  %s560_s0, 64, %s20_s26, [#allocation4]  }
  0x19   :  { %s466_s7 = scalar_lea.vmem %s43_s28, 1024  ;;  %p471_p11 = scmp.lt.s32.totalorder %s43_s28, %s43_s28 }
  0x1a   :  { %p467_p10 = scmp.ne.s32.totalorder %s43_s28, %s466_s7  ;;  %p472_p12 = scmp.lt.s32.totalorder %s466_s7, %s466_s7 }
  0x1c   :  { %p473_p13 = por %p472_p12, %p471_p11 }
  0x1e   :  { %p474_p0 = pnand %p473_p13, %p467_p10 }
  0x20   :  { %477 = shalt.err (!%p474_p0)
}
  0x21   :  { %48 = dma.hbm_to_vmem [thread:$0]  %s563_s3, 1024, %s43_s28, [#allocation7], %s505_s21, %s505_s21, %s506_s22  }
  0x22   :  { %498 = dma.done.wait [#allocation4], 64  }
  0x23   :  { %499 = vsyncadd [#allocation4], 4294967232 }
  0x24   :  { %500 = dma.done.wait [#allocation7], 2048  }
  0x25   :  { %501 = vsyncadd [#allocation7], 4294965248  ;;  %v509_v0 = vmov 0.0   ;;  %vm510_vm0 = vmmov 0   ;;  %v400_v1 = vld [vmem:[#allocation6 + $0x38] sm:$0xff]   ;;  %v401_v2 = vld [vmem:[#allocation6 + $0x30] sm:$0xff]  }
  0x26   :  { %352 = vmatprep.subr.bf16.mxu0 %v509_v0  ;;  %368 = vmatprep.mubr.msk.bf16.mxu0 %vm510_vm0, %v509_v0  ;;  %v402_v3 = vld [vmem:[#allocation6 + $0x28] sm:$0xff]   ;;  %v408_v4 = vld [vmem:[#allocation8 + $0x38] sm:$0xff]   ;;  %v403_v5 = vld [vmem:[#allocation6 + $0x20] sm:$0xff]   ;;  %s511_s11 = smov [#allocation9]  }
  0x27   :  { %372 = vmatprep.subr.bf16.mxu1 %v509_v0  ;;  %388 = vmatprep.mubr.msk.bf16.mxu1 %vm510_vm0, %v509_v0  ;;  %v409_v6 = vld [vmem:[#allocation8 + $0x30] sm:$0xff]   ;;  %v404_v7 = vld [vmem:[#allocation6 + $0x18] sm:$0xff]   ;;  %v410_v8 = vld [vmem:[#allocation8 + $0x28] sm:$0xff]   ;;  %s306_s12 = sshll.u32 %s511_s11, 4  ;;  %s307_s12 = int_to_ptr.vmem [resolvable:$true] %s306_s12 }
  0x28   :  { %353 = vmatpush3.bf16.msra.mxu0 %v400_v1  ;;  %373 = vmatpush3.bf16.msra.mxu1 %v408_v4  ;;  %v405_v9 = vld [vmem:[#allocation6 + $0x10] sm:$0xff]   ;;  %v406_v10 = vld [vmem:[#allocation6 + $0x8] sm:$0xff]   ;;  %v407_v11 = vld [vmem:[#allocation6] sm:$0xff]   ;;  %p483_p2 = scmp.lt.s32.totalorder %s307_s12, %s307_s12 }
  0x29   :  { %354 = vmatprep.subr.bf16.mxu0 %v509_v0  ;;  %374 = vmatprep.subr.bf16.mxu1 %v509_v0  ;;  %v67_v12 = vld [vmem:[#allocation3] sm:$0xf]  ;;  %v411_v13 = vld [vmem:[#allocation8 + $0x20] sm:$0xff]   ;;  %v413_v15 = vld [vmem:[#allocation8 + $0x10] sm:$0xff]  }
  0x2a   :  { %v412_v14 = vld [vmem:[#allocation8 + $0x18] sm:$0xff]   ;;  %v414_v16 = vld [vmem:[#allocation8 + $0x8] sm:$0xff]   ;;  %v415_v17 = vld [vmem:[#allocation8] sm:$0xff]  }
  0x2b   :  { %v324_v18 = vld [vmem:[%s562_s2] ss:$0 sm:$0xff]  ;;  %s478_s2 = scalar_lea.vmem %s307_s12, 128 }
  0x2c   :  { %355 = vmatpush3.bf16.msra.mxu0 %v401_v2  ;;  %375 = vmatpush3.bf16.msra.mxu1 %v409_v6  ;;  %v325_v26 = vld [vmem:[%s564_s4] ss:$0 sm:$0xff]  ;;  %p479_p1 = scmp.ne.s32.totalorder %s307_s12, %s478_s2  ;;  %p484_p3 = scmp.lt.s32.totalorder %s478_s2, %s478_s2 }
  0x2d   :  { %356 = vmatprep.subr.bf16.mxu0 %v509_v0  ;;  %376 = vmatprep.subr.bf16.mxu1 %v509_v0 }
  0x2e   :  { %p485_p4 = por %p484_p3, %p483_p2 }
  0x30   :  { %357 = vmatpush3.bf16.msra.mxu0 %v402_v3  ;;  %377 = vmatpush3.bf16.msra.mxu1 %v410_v8  ;;  %p486_p5 = pnand %p485_p4, %p479_p1 }
  0x31   :  { %358 = vmatprep.subr.bf16.mxu0 %v509_v0  ;;  %378 = vmatprep.subr.bf16.mxu1 %v509_v0 }
  0x34   :  { %359 = vmatpush3.bf16.msra.mxu0 %v403_v5  ;;  %379 = vmatpush3.bf16.msra.mxu1 %v411_v13 }
  0x35   :  { %360 = vmatprep.subr.bf16.mxu0 %v509_v0  ;;  %380 = vmatprep.subr.bf16.mxu1 %v509_v0 }
  0x38   :  { %361 = vmatpush3.bf16.msra.mxu0 %v404_v7  ;;  %381 = vmatpush3.bf16.msra.mxu1 %v412_v14 }
  0x39   :  { %362 = vmatprep.subr.bf16.mxu0 %v509_v0  ;;  %382 = vmatprep.subr.bf16.mxu1 %v509_v0 }
  0x3c   :  { %363 = vmatpush3.bf16.msra.mxu0 %v405_v9  ;;  %383 = vmatpush3.bf16.msra.mxu1 %v413_v15 }
  0x3d   :  { %364 = vmatprep.subr.bf16.mxu0 %v509_v0  ;;  %384 = vmatprep.subr.bf16.mxu1 %v509_v0 }
  0x40   :  { %365 = vmatpush3.bf16.msra.mxu0 %v406_v10  ;;  %385 = vmatpush3.bf16.msra.mxu1 %v414_v16 }
  0x41   :  { %366 = vmatprep.subr.bf16.mxu0 %v509_v0  ;;  %386 = vmatprep.subr.bf16.mxu1 %v509_v0 }
  0x44   :  { %367 = vmatpush3.bf16.msra.mxu0 %v407_v11  ;;  %387 = vmatpush3.bf16.msra.mxu1 %v415_v17 }
  0x47   :  { %369 = vmatmul.mubr.bf16.vlgmr.msra.gmra.mxu0 %v67_v12 }
 0x107   :  { %v166_v19 = vpop.f32.mrf.mxu0 }
 0x108   :  { %v185_v20 = vadd.f32 %v324_v18, %v166_v19 }
 0x109   :  { %v370_v21 = vpop.f32.mrf.mxu0 }
 0x10a   :  { %416 = vtanh.f32 %v185_v20 }
 0x10b   :  { %v169_v22 = vpop.f32.mrf.mxu0 }
 0x10d   :  { %v371_v23 = vpop.f32.mrf.mxu0 }
 0x117   :  { %v417_v24 = vpop.eup %416 }
 0x118   :  { %v187_v25 = vpack.c.bf16 %v417_v24, %v417_v24 }
 0x11a   :  { %389 = vmatmul.mubr.bf16.vlgmr.msra.gmra.mxu1 %v187_v25 }
 0x1da   :  { %v293_v27 = vpop.f32.mrf.mxu1 }
 0x1db   :  { %v294_v28 = vadd.f32 %v325_v26, %v293_v27 }
 0x1dc   :  { %v390_v29 = vpop.f32.mrf.mxu1 }
 0x1dd   :  { %299 = vst [vmem:[#allocation9] sm:$0xff] %v294_v28 }
 0x1de   :  { %v296_v30 = vpop.f32.mrf.mxu1 }
 0x1df   :  { %489 = shalt.err (!%p486_p5)
}
 0x1e0   :  { %309 = dma.vmem_to_hbm [thread:$0]  %s307_s12, 128, %s565_s5, [#allocation5]   ;;  %v391_v31 = vpop.f32.mrf.mxu1 }
 0x1e1   :  { %502 = dma.done.wait [#allocation5], 128  }
 0x1e2   :  { %503 = vsyncadd [#allocation5], 4294967168 }
 0x1e3   :  { %313 = vsyncpa [#allocation4], 1 }
 0x1e4   :  { %314 = vsyncpa [#allocation7], 1 }
 0x1e5   :  { %315 = vsyncpa [#allocation5], 1 }

// kernel: tpu_custom_call.1
= control target key start
LH: loop header
LB: loop body
LE: loop exit
PB: predicated region body
PF: predicated region fallthrough
CT: control target
= control target key end

     0   :  { %10 = vsyncpa [#allocation4], 0  ;;  %s560_s0 = inlined_call_operand.hbm [shape: bf16[8,128], index: 0, kind: input, shape index: {}]   ;;  %s561_s1 = inlined_call_operand.hbm [shape: bf16[128,128], index: 1, kind: input, shape index: {}]   ;;  %s562_s2 = inlined_call_operand.vmem [shape: f32[1,128], index: 2, kind: input, shape index: {}]   ;;  %s563_s3 = inlined_call_operand.hbm [shape: bf16[128,128], index: 3, kind: input, shape index: {}]   ;;  %s564_s4 = inlined_call_operand.vmem [shape: f32[1,128], index: 4, kind: input, shape index: {}]   ;;  %s565_s5 = inlined_call_operand.hbm [shape: f32[8,128], index: 5, kind: output, shape index: {}]  }
   0x1   :  { %11 = vsyncpa [#allocation7], 0 }
   0x2   :  { %12 = vsyncpa [#allocation5], 0  ;;  %s504_s18 = smov [#allocation6]  }
   0x3   :  { %s28_s19 = sshll.u32 %s504_s18, 4  ;;  %s29_s19 = int_to_ptr.vmem [resolvable:$true] %s28_s19 }
   0x4   :  { %s426_s20 = scalar_lea.vmem %s29_s19, 1024  ;;  %p431_p1 = scmp.lt.s32.totalorder %s29_s19, %s29_s19 }
   0x5   :  { %p427_p0 = scmp.ne.s32.totalorder %s29_s19, %s426_s20  ;;  %p432_p2 = scmp.lt.s32.totalorder %s426_s20, %s426_s20 }
   0x7   :  { %p433_p3 = por %p432_p2, %p431_p1 }
   0x9   :  { %p434_p4 = pnand %p433_p3, %p427_p0 }
   0xb   :  { %437 = shalt.err (!%p434_p4)
}
   0xc   :  { %s505_s21 = smov 64   ;;  %s506_s22 = smov 4  }
   0xd   :  { %34 = dma.hbm_to_vmem [thread:$0]  %s561_s1, 1024, %s29_s19, [#allocation7], %s505_s21, %s505_s21, %s506_s22  }
   0xe   :  { %s507_s25 = smov [#allocation3]   ;;  %s508_s27 = smov [#allocation8]  }
   0xf   :  { %s19_s26 = sshll.u32 %s507_s25, 4  ;;  %s42_s28 = sshll.u32 %s508_s27, 4  ;;  %s20_s26 = int_to_ptr.vmem [resolvable:$true] %s19_s26  ;;  %s43_s28 = int_to_ptr.vmem [resolvable:$true] %s42_s28 }
  0x10   :  { %s446_s29 = scalar_lea.vmem %s20_s26, 64  ;;  %p451_p6 = scmp.lt.s32.totalorder %s20_s26, %s20_s26 }
  0x11   :  { %p447_p5 = scmp.ne.s32.totalorder %s20_s26, %s446_s29  ;;  %p452_p7 = scmp.lt.s32.totalorder %s446_s29, %s446_s29 }
  0x13   :  { %p453_p8 = por %p452_p7, %p451_p6 }
  0x15   :  { %p454_p9 = pnand %p453_p8, %p447_p5 }
  0x17   :  { %457 = shalt.err (!%p454_p9)
}
  0x18   :  { %22 = dma.hbm_to_vmem [thread:$0]  %s560_s0, 64, %s20_s26, [#allocation4]  }
  0x19   :  { %s466_s7 = scalar_lea.vmem %s43_s28, 1024  ;;  %p471_p11 = scmp.lt.s32.totalorder %s43_s28, %s43_s28 }
  0x1a   :  { %p467_p10 = scmp.ne.s32.totalorder %s43_s28, %s466_s7  ;;  %p472_p12 = scmp.lt.s32.totalorder %s466_s7, %s466_s7 }
  0x1c   :  { %p473_p13 = por %p472_p12, %p471_p11 }
  0x1e   :  { %p474_p0 = pnand %p473_p13, %p467_p10 }
  0x20   :  { %477 = shalt.err (!%p474_p0)
}
  0x21   :  { %48 = dma.hbm_to_vmem [thread:$0]  %s563_s3, 1024, %s43_s28, [#allocation7], %s505_s21, %s505_s21, %s506_s22  }
  0x22   :  { %498 = dma.done.wait [#allocation4], 64  }
  0x23   :  { %499 = vsyncadd [#allocation4], 4294967232 }
  0x24   :  { %500 = dma.done.wait [#allocation7], 2048  }
  0x25   :  { %501 = vsyncadd [#allocation7], 4294965248  ;;  %v509_v0 = vmov 0.0   ;;  %vm510_vm0 = vmmov 0   ;;  %v400_v1 = vld [vmem:[#allocation6 + $0x38] sm:$0xff]   ;;  %v401_v2 = vld [vmem:[#allocation6 + $0x30] sm:$0xff]  }
  0x26   :  { %352 = vmatprep.subr.bf16.mxu0 %v509_v0  ;;  %368 = vmatprep.mubr.msk.bf16.mxu0 %vm510_vm0, %v509_v0  ;;  %v402_v3 = vld [vmem:[#allocation6 + $0x28] sm:$0xff]   ;;  %v408_v4 = vld [vmem:[#allocation8 + $0x38] sm:$0xff]   ;;  %v403_v5 = vld [vmem:[#allocation6 + $0x20] sm:$0xff]   ;;  %s511_s11 = smov [#allocation9]  }
  0x27   :  { %372 = vmatprep.subr.bf16.mxu1 %v509_v0  ;;  %388 = vmatprep.mubr.msk.bf16.mxu1 %vm510_vm0, %v509_v0  ;;  %v409_v6 = vld [vmem:[#allocation8 + $0x30] sm:$0xff]   ;;  %v404_v7 = vld [vmem:[#allocation6 + $0x18] sm:$0xff]   ;;  %v410_v8 = vld [vmem:[#allocation8 + $0x28] sm:$0xff]   ;;  %s306_s12 = sshll.u32 %s511_s11, 4  ;;  %s307_s12 = int_to_ptr.vmem [resolvable:$true] %s306_s12 }
  0x28   :  { %353 = vmatpush3.bf16.msra.mxu0 %v400_v1  ;;  %373 = vmatpush3.bf16.msra.mxu1 %v408_v4  ;;  %v405_v9 = vld [vmem:[#allocation6 + $0x10] sm:$0xff]   ;;  %v406_v10 = vld [vmem:[#allocation6 + $0x8] sm:$0xff]   ;;  %v407_v11 = vld [vmem:[#allocation6] sm:$0xff]   ;;  %p483_p2 = scmp.lt.s32.totalorder %s307_s12, %s307_s12 }
  0x29   :  { %354 = vmatprep.subr.bf16.mxu0 %v509_v0  ;;  %374 = vmatprep.subr.bf16.mxu1 %v509_v0  ;;  %v67_v12 = vld [vmem:[#allocation3] sm:$0xf]  ;;  %v411_v13 = vld [vmem:[#allocation8 + $0x20] sm:$0xff]   ;;  %v413_v15 = vld [vmem:[#allocation8 + $0x10] sm:$0xff]  }
  0x2a   :  { %v412_v14 = vld [vmem:[#allocation8 + $0x18] sm:$0xff]   ;;  %v414_v16 = vld [vmem:[#allocation8 + $0x8] sm:$0xff]   ;;  %v415_v17 = vld [vmem:[#allocation8] sm:$0xff]  }
  0x2b   :  { %v324_v18 = vld [vmem:[%s562_s2] ss:$0 sm:$0xff]  ;;  %s478_s2 = scalar_lea.vmem %s307_s12, 128 }
  0x2c   :  { %355 = vmatpush3.bf16.msra.mxu0 %v401_v2  ;;  %375 = vmatpush3.bf16.msra.mxu1 %v409_v6  ;;  %v325_v26 = vld [vmem:[%s564_s4] ss:$0 sm:$0xff]  ;;  %p479_p1 = scmp.ne.s32.totalorder %s307_s12, %s478_s2  ;;  %p484_p3 = scmp.lt.s32.totalorder %s478_s2, %s478_s2 }
  0x2d   :  { %356 = vmatprep.subr.bf16.mxu0 %v509_v0  ;;  %376 = vmatprep.subr.bf16.mxu1 %v509_v0 }
  0x2e   :  { %p485_p4 = por %p484_p3, %p483_p2 }
  0x30   :  { %357 = vmatpush3.bf16.msra.mxu0 %v402_v3  ;;  %377 = vmatpush3.bf16.msra.mxu1 %v410_v8  ;;  %p486_p5 = pnand %p485_p4, %p479_p1 }
  0x31   :  { %358 = vmatprep.subr.bf16.mxu0 %v509_v0  ;;  %378 = vmatprep.subr.bf16.mxu1 %v509_v0 }
  0x34   :  { %359 = vmatpush3.bf16.msra.mxu0 %v403_v5  ;;  %379 = vmatpush3.bf16.msra.mxu1 %v411_v13 }
  0x35   :  { %360 = vmatprep.subr.bf16.mxu0 %v509_v0  ;;  %380 = vmatprep.subr.bf16.mxu1 %v509_v0 }
  0x38   :  { %361 = vmatpush3.bf16.msra.mxu0 %v404_v7  ;;  %381 = vmatpush3.bf16.msra.mxu1 %v412_v14 }
  0x39   :  { %362 = vmatprep.subr.bf16.mxu0 %v509_v0  ;;  %382 = vmatprep.subr.bf16.mxu1 %v509_v0 }
  0x3c   :  { %363 = vmatpush3.bf16.msra.mxu0 %v405_v9  ;;  %383 = vmatpush3.bf16.msra.mxu1 %v413_v15 }
  0x3d   :  { %364 = vmatprep.subr.bf16.mxu0 %v509_v0  ;;  %384 = vmatprep.subr.bf16.mxu1 %v509_v0 }
  0x40   :  { %365 = vmatpush3.bf16.msra.mxu0 %v406_v10  ;;  %385 = vmatpush3.bf16.msra.mxu1 %v414_v16 }
  0x41   :  { %366 = vmatprep.subr.bf16.mxu0 %v509_v0  ;;  %386 = vmatprep.subr.bf16.mxu1 %v509_v0 }
  0x44   :  { %367 = vmatpush3.bf16.msra.mxu0 %v407_v11  ;;  %387 = vmatpush3.bf16.msra.mxu1 %v415_v17 }
  0x47   :  { %369 = vmatmul.mubr.bf16.vlgmr.msra.gmra.mxu0 %v67_v12 }
 0x107   :  { %v166_v19 = vpop.f32.mrf.mxu0 }
 0x108   :  { %v185_v20 = vadd.f32 %v324_v18, %v166_v19 }
 0x109   :  { %v370_v21 = vpop.f32.mrf.mxu0 }
 0x10a   :  { %416 = vtanh.f32 %v185_v20 }
 0x10b   :  { %v169_v22 = vpop.f32.mrf.mxu0 }
 0x10d   :  { %v371_v23 = vpop.f32.mrf.mxu0 }
 0x117   :  { %v417_v24 = vpop.eup %416 }
 0x118   :  { %v187_v25 = vpack.c.bf16 %v417_v24, %v417_v24 }
 0x11a   :  { %389 = vmatmul.mubr.bf16.vlgmr.msra.gmra.mxu1 %v187_v25 }
 0x1da   :  { %v293_v27 = vpop.f32.mrf.mxu1 }
 0x1db   :  { %v294_v28 = vadd.f32 %v325_v26, %v293_v27 }
 0x1dc   :  { %v390_v29 = vpop.f32.mrf.mxu1 }
 0x1dd   :  { %299 = vst [vmem:[#allocation9] sm:$0xff] %v294_v28 }
 0x1de   :  { %v296_v30 = vpop.f32.mrf.mxu1 }
 0x1df   :  { %489 = shalt.err (!%p486_p5)
}
 0x1e0   :  { %309 = dma.vmem_to_hbm [thread:$0]  %s307_s12, 128, %s565_s5, [#allocation5]   ;;  %v391_v31 = vpop.f32.mrf.mxu1 }
 0x1e1   :  { %502 = dma.done.wait [#allocation5], 128  }
 0x1e2   :  { %503 = vsyncadd [#allocation5], 4294967168 }
 0x1e3   :  { %313 = vsyncpa [#allocation4], 1 }
 0x1e4   :  { %314 = vsyncpa [#allocation7], 1 }
 0x1e5   :  { %315 = vsyncpa [#allocation5], 1 }

</bundles_post_ra>
